<compile_context>
chip_gen: v7x
topology: tpu7x:2x2x1
jax: 0.10.0
libtpu: 0.0.40
codegen_flags: <defaults>
</compile_context>

<pallas_src>
import functools

import jax
import jax.numpy as jnp
from jax import lax
from jax.experimental import pallas as pl
from jax.experimental.pallas import tpu as pltpu


def _round_up(x, m):
    return ((x + m - 1) // m) * m


def _choose_tile_n(n, c, itemsize, vmem_budget_bytes=8 * 1024 * 1024):
    """Largest multiple-of-8 row tile whose double-buffered logits fit budget."""
    max_rows = vmem_budget_bytes // max(1, 2 * c * itemsize)   # 2x: double buffer
    tile_n = min(512, _round_up(n, 8), max(8, (max_rows // 8) * 8))
    return max(8, (tile_n // 8) * 8)


def ldam_kernel(x_ref, tgt_ref, m_ref, out_ref, *, s, n_valid, tile_n):
    i = pl.program_id(0)

    @pl.when(i == 0)
    def _():
        out_ref[...] = jnp.zeros_like(out_ref)

    x = x_ref[...].astype(jnp.float32)          # [tile_n, C]  (bf16/f32 -> f32)
    tgt = tgt_ref[...]                          # [tile_n, 1]  int32 labels
    m = m_ref[...]                              # [1, C]       f32 margins

    tn, C = x.shape

    # boolean one-hot built in-kernel (replaces index.scatter_); never upcast.
    class_ids = lax.broadcasted_iota(jnp.int32, (tn, C), 1)
    onehot = class_ids == tgt                   # bool [tile_n, C]

    # z = s * (x - onehot * m)  ==  s * where(onehot, x - batch_m, x)
    z = s * (x - jnp.where(onehot, m, 0.0))     # [tile_n, C] f32

    # cross entropy (weight=None): loss_i = logsumexp(z_i) - z_i[target_i]
    zmax = jnp.max(z, axis=1, keepdims=True)                              # XLU
    lse = jnp.log(jnp.sum(jnp.exp(z - zmax), axis=1, keepdims=True)) + zmax
    z_t = jnp.sum(jnp.where(onehot, z, 0.0), axis=1, keepdims=True)

    # mask out rows that only exist because of batch padding
    row_ids = i * tile_n + lax.broadcasted_iota(jnp.int32, (tn, 1), 0)
    per_sample = jnp.where(row_ids < n_valid, lse - z_t, 0.0)             # [tile_n, 1]

    # resident (1,1) output doubles as the accumulator -- no scratch needed.
    out_ref[...] += jnp.sum(per_sample, axis=0, keepdims=True)

    @pl.when(i == pl.num_programs(0) - 1)
    def _():
        out_ref[...] = out_ref[...] * (1.0 / float(n_valid))   # mean over true N


def ldam_loss(x, target, m_list, *, s=30.0, tile_n=None):
    """x: [N, C] logits (f32 or bf16), target: [N] int labels, m_list: [C] f32."""
    N, C = x.shape

    if tile_n is None:
        tile_n = _choose_tile_n(N, C, x.dtype.itemsize)
    else:
        tile_n = max(8, (min(int(tile_n), _round_up(N, 8)) // 8) * 8)

    n_pad = _round_up(N, tile_n)
    if n_pad != N:
        x = jnp.pad(x, ((0, n_pad - N), (0, 0)))
        target = jnp.pad(target, (0, n_pad - N))

    tgt = target.reshape(n_pad, 1).astype(jnp.int32)
    m = m_list.reshape(1, C).astype(jnp.float32)
    # NOTE: no x.astype(f32) here -- bf16 logits stream from HBM at half the
    # bytes and are cast inside the kernel after the load.

    out = pl.pallas_call(
        functools.partial(
            ldam_kernel, s=float(s), n_valid=int(N), tile_n=int(tile_n)
        ),
        out_shape=jax.ShapeDtypeStruct((1, 1), jnp.float32),
        grid=(n_pad // tile_n,),
        in_specs=[
            pl.BlockSpec((tile_n, C), lambda i: (i, 0)),   # logits tile
            pl.BlockSpec((tile_n, 1), lambda i: (i, 0)),   # labels tile
            pl.BlockSpec((1, C), lambda i: (0, 0)),        # margins (resident)
        ],
        out_specs=pl.BlockSpec((1, 1), lambda i: (0, 0)),  # resident accumulator
        compiler_params=pltpu.CompilerParams(
            dimension_semantics=("arbitrary",),            # resident output axis
        ),
    )(x, tgt, m)
    return out[0, 0]
    # TODO(synk): for very large class counts (C*tile too big for VMEM even at
    # tile_n=8), additionally tile the C axis with an online logsumexp.


def make_m_list(cls_num_list, max_m=0.5):
    # m_list = 1 / sqrt(sqrt(n_c)), rescaled so max(m_list) == max_m
    m = 1.0 / jnp.sqrt(jnp.sqrt(cls_num_list.astype(jnp.float32)))
    m = m * (max_m / jnp.max(m))
    return m


def ldam_loss_ref(x, target, m_list, *, s=30.0):
    # pure-JAX reference for sanity checking
    x = x.astype(jnp.float32)
    N, C = x.shape
    onehot = jax.nn.one_hot(target, C, dtype=jnp.float32)
    batch_m = (onehot * m_list[None, :]).sum(axis=1, keepdims=True)
    output = jnp.where(onehot > 0, x - batch_m, x)
    z = s * output
    logp = jax.nn.log_softmax(z, axis=1)
    return -jnp.mean(jnp.sum(onehot * logp, axis=1))


# TODO(synk): per-class `weight=` of F.cross_entropy not implemented (module is
# constructed with weight=None by default); ignore_index=-100 is not handled.


if __name__ == "__main__":
    key = jax.random.PRNGKey(0)
    N, C = 8, 16  # small batch of logits over 16 classes

    k1, k2 = jax.random.split(key, 2)
    # bf16 logits: the kernel consumes them directly (no wrapper upcast)
    x = jax.random.normal(k1, (N, C), dtype=jnp.float32).astype(jnp.bfloat16)
    target = jax.random.randint(k2, (N,), 0, C, dtype=jnp.int32)

    # deterministic synthetic class counts (imbalanced), as in __init__
    cls_num_list = jnp.array(
        [1000, 800, 600, 500, 400, 300, 250, 200, 150, 120, 100, 80, 60, 40, 20, 10],
        dtype=jnp.float32,
    )
    m_list = make_m_list(cls_num_list, max_m=0.5)

    loss = ldam_loss(x, target, m_list, s=30.0)
    jax.block_until_ready(loss)

    ref = ldam_loss_ref(x, target, m_list, s=30.0)
    assert jnp.allclose(loss, ref, rtol=1e-4, atol=1e-4), (loss, ref)

    print("KERNEL_OK")
</pallas_src>

<mosaic_0001>
module attributes {stable_mosaic.version = 11 : i64} {
  func.func @ldam_kernel(%arg0: i32, %arg1: memref<8x16xbf16, #tpu.memory_space<vmem>>, %arg2: memref<8x1xi32, #tpu.memory_space<vmem>>, %arg3: memref<1x16xf32, #tpu.memory_space<vmem>>, %arg4: memref<1x1xf32, #tpu.memory_space<vmem>>) attributes {dimension_semantics = [#tpu.dimension_semantics<arbitrary>], iteration_bounds = array<i64: 1>, scalar_prefetch = 0 : i64, scratch_operands = 0 : i64, tpu.core_type = #tpu.core_type<tc>, window_params = [{transform_indices = @transform_0, window_bounds = array<i64: 8, 16>}, {transform_indices = @transform_1, window_bounds = array<i64: 8, 1>}, {pipeline_mode = #tpu.pipeline_mode<synchronous>, transform_indices = @transform_2, window_bounds = array<i64: 1, 16>}, {pipeline_mode = #tpu.pipeline_mode<synchronous>, transform_indices = @transform_3, window_bounds = array<i64: 1, 1>}]} {
    %c0_i32 = arith.constant 0 : i32
    %0 = arith.cmpi eq, %arg0, %c0_i32 : i32
    %1 = arith.extui %0 : i1 to i32
    %c0_i32_0 = arith.constant 0 : i32
    %2 = arith.cmpi ne, %1, %c0_i32_0 : i32
    scf.if %2 {
      %cst_20 = arith.constant 0.000000e+00 : f32
      %47 = vector.broadcast %cst_20 : f32 to vector<1x1xf32>
      %c0_21 = arith.constant 0 : index
      %c0_22 = arith.constant 0 : index
      %48 = vector.load %arg4[%c0_21, %c0_22] : memref<1x1xf32, #tpu.memory_space<vmem>>, vector<1x1xf32>
      tpu.vector_store %arg4[%c0_21, %c0_22], %47 {strides = array<i32>} : memref<1x1xf32, #tpu.memory_space<vmem>>, vector<1x1xf32>,
    } else {
    }
    %c0 = arith.constant 0 : index
    %c0_1 = arith.constant 0 : index
    %3 = vector.load %arg1[%c0, %c0_1] : memref<8x16xbf16, #tpu.memory_space<vmem>>, vector<8x16xbf16>
    %4 = arith.extf %3 : vector<8x16xbf16> to vector<8x16xf32>
    %c0_2 = arith.constant 0 : index
    %c0_3 = arith.constant 0 : index
    %5 = vector.load %arg2[%c0_2, %c0_3] : memref<8x1xi32, #tpu.memory_space<vmem>>, vector<8x1xi32>
    %c0_4 = arith.constant 0 : index
    %c0_5 = arith.constant 0 : index
    %6 = vector.load %arg3[%c0_4, %c0_5] : memref<1x16xf32, #tpu.memory_space<vmem>>, vector<1x16xf32>
    %7 = tpu.iota {dimensions = array<i32: 1>} : vector<8x16xi32>
    %8 = vector.broadcast %5 : vector<8x1xi32> to vector<8x16xi32>
    %9 = arith.cmpi eq, %7, %8 : vector<8x16xi32>
    %cst = arith.constant 0.000000e+00 : f32
    %10 = vector.shape_cast %6 : vector<1x16xf32> to vector<1x16xf32>
    %11 = vector.broadcast %10 : vector<1x16xf32> to vector<8x16xf32>
    %12 = vector.broadcast %cst : f32 to vector<8x16xf32>
    %13 = arith.select %9, %11, %12 : vector<8x16xi1>, vector<8x16xf32>
    %14 = arith.subf %4, %13 : vector<8x16xf32>
    %cst_6 = arith.constant 3.000000e+01 : f32
    %15 = vector.broadcast %cst_6 : f32 to vector<8x16xf32>
    %16 = arith.mulf %15, %14 : vector<8x16xf32>
    %cst_7 = arith.constant dense<0xFF800000> : vector<8xf32>
    %17 = vector.multi_reduction <maximumf>, %16, %cst_7 [1] : vector<8x16xf32> to vector<8xf32>
    %18 = vector.shape_cast %17 : vector<8xf32> to vector<8x1xf32>
    %19 = vector.broadcast %18 : vector<8x1xf32> to vector<8x16xf32>
    %20 = arith.subf %16, %19 : vector<8x16xf32>
    %21 = math.exp %20 : vector<8x16xf32>
    %cst_8 = arith.constant dense<0.000000e+00> : vector<8xf32>
    %22 = vector.multi_reduction <add>, %21, %cst_8 [1] : vector<8x16xf32> to vector<8xf32>
    %23 = vector.shape_cast %22 : vector<8xf32> to vector<8x1xf32>
    %24 = math.log %23 : vector<8x1xf32>
    %25 = arith.addf %24, %18 : vector<8x1xf32>
    %cst_9 = arith.constant 0.000000e+00 : f32
    %26 = vector.broadcast %cst_9 : f32 to vector<8x16xf32>
    %27 = arith.select %9, %16, %26 : vector<8x16xi1>, vector<8x16xf32>
    %cst_10 = arith.constant dense<0.000000e+00> : vector<8xf32>
    %28 = vector.multi_reduction <add>, %27, %cst_10 [1] : vector<8x16xf32> to vector<8xf32>
    %29 = vector.shape_cast %28 : vector<8xf32> to vector<8x1xf32>
    %c8_i32 = arith.constant 8 : i32
    %30 = arith.muli %arg0, %c8_i32 : i32
    %31 = tpu.iota {dimensions = array<i32: 0>} : vector<8x1xi32>
    %32 = vector.broadcast %30 : i32 to vector<8x1xi32>
    %33 = arith.addi %32, %31 : vector<8x1xi32>
    %c8_i32_11 = arith.constant 8 : i32
    %34 = vector.broadcast %c8_i32_11 : i32 to vector<8x1xi32>
    %35 = arith.cmpi slt, %33, %34 : vector<8x1xi32>
    %36 = arith.subf %25, %29 : vector<8x1xf32>
    %cst_12 = arith.constant 0.000000e+00 : f32
    %37 = vector.broadcast %cst_12 : f32 to vector<8x1xf32>
    %38 = arith.select %35, %36, %37 : vector<8x1xi1>, vector<8x1xf32>
    %c0_13 = arith.constant 0 : index
    %c0_14 = arith.constant 0 : index
    %39 = vector.load %arg4[%c0_13, %c0_14] : memref<1x1xf32, #tpu.memory_space<vmem>>, vector<1x1xf32>
    %cst_15 = arith.constant dense<0.000000e+00> : vector<1xf32>
    %40 = vector.multi_reduction <add>, %38, %cst_15 [0] : vector<8x1xf32> to vector<1xf32>
    %41 = vector.shape_cast %40 : vector<1xf32> to vector<1x1xf32>
    %42 = arith.addf %39, %41 : vector<1x1xf32>
    %c0_16 = arith.constant 0 : index
    %c0_17 = arith.constant 0 : index
    %43 = vector.load %arg4[%c0_16, %c0_17] : memref<1x1xf32, #tpu.memory_space<vmem>>, vector<1x1xf32>
    tpu.vector_store %arg4[%c0_16, %c0_17], %42 {strides = array<i32>} : memref<1x1xf32, #tpu.memory_space<vmem>>, vector<1x1xf32>,
    %c0_i32_18 = arith.constant 0 : i32
    %44 = arith.cmpi eq, %arg0, %c0_i32_18 : i32
    %45 = arith.extui %44 : i1 to i32
    %c0_i32_19 = arith.constant 0 : i32
    %46 = arith.cmpi ne, %45, %c0_i32_19 : i32
    scf.if %46 {
      %c0_20 = arith.constant 0 : index
      %c0_21 = arith.constant 0 : index
      %47 = vector.load %arg4[%c0_20, %c0_21] : memref<1x1xf32, #tpu.memory_space<vmem>>, vector<1x1xf32>
      %cst_22 = arith.constant 1.250000e-01 : f32
      %48 = vector.broadcast %cst_22 : f32 to vector<1x1xf32>
      %49 = arith.mulf %47, %48 : vector<1x1xf32>
      %c0_23 = arith.constant 0 : index
      %c0_24 = arith.constant 0 : index
      %50 = vector.load %arg4[%c0_23, %c0_24] : memref<1x1xf32, #tpu.memory_space<vmem>>, vector<1x1xf32>
      tpu.vector_store %arg4[%c0_23, %c0_24], %49 {strides = array<i32>} : memref<1x1xf32, #tpu.memory_space<vmem>>, vector<1x1xf32>,
    } else {
    }
    return
  }
  func.func @transform_0(%arg0: i32) -> (i32, i32) {
    %c0_i32 = arith.constant 0 : i32
    %c0_i32_0 = arith.constant 0 : i32
    return %arg0, %c0_i32 : i32, i32
  }
  func.func @transform_1(%arg0: i32) -> (i32, i32) {
    %c0_i32 = arith.constant 0 : i32
    %c0_i32_0 = arith.constant 0 : i32
    return %arg0, %c0_i32 : i32, i32
  }
  func.func @transform_2(%arg0: i32) -> (i32, i32) {
    %c0_i32 = arith.constant 0 : i32
    %c0_i32_0 = arith.constant 0 : i32
    %c0_i32_1 = arith.constant 0 : i32
    return %c0_i32, %c0_i32_0 : i32, i32
  }
  func.func @transform_3(%arg0: i32) -> (i32, i32) {
    %c0_i32 = arith.constant 0 : i32
    %c0_i32_0 = arith.constant 0 : i32
    %c0_i32_1 = arith.constant 0 : i32
    return %c0_i32, %c0_i32_0 : i32, i32
  }
}

</mosaic_0001>

<bundles_post_ra>
// kernel: tpu_custom_call.1
= control target key start
LH: loop header
LB: loop body
LE: loop exit
PB: predicated region body
PF: predicated region fallthrough
CT: control target
= control target key end

     0   :  { %s175_s0 = inlined_call_operand.vmem [shape: bf16[8,16], index: 0, kind: input, shape index: {}]   ;;  %s176_s1 = inlined_call_operand.vmem [shape: s32[8,1], index: 1, kind: input, shape index: {}]   ;;  %s177_s2 = inlined_call_operand.vmem [shape: f32[1,16], index: 2, kind: input, shape index: {}]   ;;  %s178_s3 = inlined_call_operand.hbm [shape: f32[1,1], index: 3, kind: output, shape index: {}]  }
   0x1   :  { %v23_v0 = vld [vmem:[%s176_s1] sm:$0xff] }
   0x2   :  { %8 = vsyncpa [#allocation3], 0  ;;  %v128_v1 = vmov 0   ;;  %v25_v2 = vlaneseq  ;;  %v21_v3 = vld [vmem:[%s175_s0] sm:$0xf]  ;;  %vm40_vm1 = vcmask 130048  }
   0x3   :  { %99 = vset.pattern.permute.xlu0 %v128_v1  ;;  %v95_v5 = vld [vmem:[%s177_s2] ss:$0 sm:$0xff]  ;;  %v22_v6 = vunpack.c.l.bf16 %v21_v3  ;;  %vm19_vm2 = vcmask 0   ;;  %v129_v19 = vmov 0.0   ;;  %s130_s0 = smov [#allocation2]  }
   0x4   :  { %28 = vperm.xlu0 %99, %v23_v0   ;;  %v26_v4 = vand.u32 127, %v25_v2  ;;  %20 = vst.msk [vmem:[#allocation2] sm:$0x1] %vm19_vm2, %v129_v19  ;;  %s87_s1 = sshll.u32 %s130_s0, 4  ;;  %s88_s1 = int_to_ptr.vmem [resolvable:$true] %s87_s1 }
   0x5   :  { %s104_s2 = scalar_lea.vmem %s88_s1, 16  ;;  %s108_s18 = scalar_lea.vmem %s88_s1, 32 }
   0x6   :  { %p105_p0 = scmp.ne.s32.totalorder %s88_s1, %s104_s2  ;;  %p109_p1 = scmp.lt.s32.totalorder %s88_s1, %s88_s1 }
   0x7   :  { %p110_p2 = scmp.lt.s32.totalorder %s108_s18, %s104_s2 }
   0x9   :  { %p111_p3 = por %p110_p2, %p109_p1 }
   0xb   :  { %v65_v31 = vld [vmem:[#allocation2] sm:$0x1]  ;;  %p112_p4 = pnand %p111_p3, %p105_p0 }
  0x83   :  { %v29_v7 = vpop.permute.xlu0 %28 }
  0x84   :  { %vm30_vm0 = vcmp.eq.s32.totalorder %v26_v4, %v29_v7 }
  0x85   :  { %v37_v8 = vsel %vm30_vm0, %v95_v5, 0.0 }
  0x86   :  { %v38_v9 = vsub.f32 %v22_v6, %v37_v8 }
  0x88   :  { %v39_v10 = vmul.f32 30.0, %v38_v9 }
  0x8a   :  { %v41_v11 = vsel %vm40_vm1, %v39_v10, -inf  ;;  %v53_v17 = vsel %vm30_vm0, %v39_v10, 0.0 }
  0x8b   :  { %42 = vmax.xlane.f32.xlu0 %v41_v11  ;;  %v54_v18 = vsel %vm40_vm1, %v53_v17, 0.0 }
 0x118   :  { %v43_v12 = vpop.xlane.xlu0 %42 }
 0x119   :  { %v44_v13 = vsub.f32 %v39_v10, %v43_v12 }
 0x11b   :  { %v45_v14 = vmul.f32 1.442695, %v44_v13 }
 0x11d   :  { %100 = vpow2.f32 %v45_v14 }
 0x127   :  { %v101_v15 = vpop.eup %100 }
 0x128   :  { %v47_v16 = vsel %vm40_vm1, %v101_v15, 0.0 }
 0x129   :  { %48 = vadd.xlane.f32.xlu1 %v47_v16 }
 0x12d   :  { %55 = vadd.xlane.f32.xlu1 %v54_v18 }
 0x1b6   :  { %v49_v20 = vpop.xlane.xlu1 %48 }
 0x1b7   :  { %102 = vlog2.f32 %v49_v20 }
 0x1ba   :  { %v56_v24 = vpop.xlane.xlu1 %55 }
 0x1c1   :  { %v103_v21 = vpop.eup %102 }
 0x1c2   :  { %v51_v22 = vmul.f32 0.6931472, %v103_v21 }
 0x1c4   :  { %v52_v23 = vadd.f32 %v51_v22, %v43_v12 }
 0x1c6   :  { %v63_v25 = vsub.f32 %v52_v23, %v56_v24 }
 0x1c8   :  { %v66_v26 = vrot.slane %v63_v25, 4 }
 0x1ca   :  { %v67_v27 = vadd.f32 %v66_v26, %v63_v25 }
 0x1cc   :  { %v68_v28 = vrot.slane %v67_v27, 2 }
 0x1ce   :  { %v69_v29 = vadd.f32 %v68_v28, %v67_v27 }
 0x1d0   :  { %v70_v30 = vrot.slane %v69_v29, 1 }
 0x1d2   :  { %v71_v32 = vadd.f32 %v70_v30, %v69_v29 }
 0x1d4   :  { %v72_v33 = vadd.f32 %v71_v32, %v65_v31 }
 0x1d6   :  { %74 = vst.msk [vmem:[#allocation2] sm:$0x1] %vm19_vm2, %v72_v33 }
 0x1dd   :  { %v78_v34 = vld [vmem:[#allocation2] sm:$0x1] }
 0x1de   :  { %v79_v35 = vmul.f32 0.125, %v78_v34 }
 0x1e0   :  { %80 = vst.msk [vmem:[#allocation2] sm:$0x1] %vm19_vm2, %v79_v35 }
 0x1e1   :  { %115 = shalt.err (!%p112_p4)
}
 0x1e2   :  { %s116_s21 = scalar_lea.hbm %s178_s3, 16 }
 0x1e3   :  { %p117_p5 = scmp.ne.s32.totalorder %s178_s3, %s116_s21  ;;  %p120_p6 = scmp.lt.u32.totalorder %s116_s21, %s178_s3 }
 0x1e5   :  { %p122_p7 = pnand %p120_p6, %p117_p5 }
 0x1e7   :  { %125 = shalt.err (!%p122_p7)
}
 0x1e8   :  { %90 = dma.vmem_to_hbm [thread:$0]  %s88_s1, 16, %s178_s3, [#allocation3]  }
 0x1e9   :  { %126 = dma.done.wait [#allocation3], 16  }
 0x1ea   :  { %127 = vsyncadd [#allocation3], 4294967280 }
 0x1eb   :  { %94 = vsyncpa [#allocation3], 1 }

</bundles_post_ra>
